<compile_context>
chip_gen: v6e
topology: v6e:2x2x1
jax: 0.10.0
libtpu: 0.0.40
codegen_flags: <defaults>
</compile_context>

<pallas_src>
import functools

import jax
import jax.numpy as jnp
from jax import lax
from jax.experimental import pallas as pl
from jax.experimental.pallas import tpu as pltpu

LANE = 128


def _focal_kernel(logs_ref, y_ref, out_ref, acc_ref, *,
                  gamma, delta, scale, eps,
                  rows_valid, tiles_per_par, needs_mask, reduce_rows):
    # logs_ref / y_ref: (C, R, 128) tiles.  acc_ref: (R, 128) f32 running sum
    # per (batch, par) group.  out_ref: (1, 1, R_out, 128) written once.
    t = pl.program_id(2)

    @pl.when(t == 0)
    def _():
        acc_ref[...] = jnp.zeros_like(acc_ref)

    x = logs_ref[...].astype(jnp.float32)        # (C, R, 128)
    y = y_ref[...].astype(jnp.float32)           # (C, R, 128)

    # Channel softmax pieces.  Axis 0 (C) is a leading block axis, so these
    # reductions are elementwise VPU ops across C vreg slabs (no XLU).
    m = jnp.max(x, axis=0, keepdims=True)        # (1, R, 128)
    xm = x - m                                   # (C, R, 128)  (bound once)
    s = jnp.sum(jnp.exp(xm), axis=0)             # (R, 128)
    log_s = jnp.log(s)                           # (R, 128)

    # log_pred is never materialized:  y_c*log_pred_c = y_c*xm_c - log_s*y_c
    y0 = y[0]
    bg_logp = y0 * xm[0] - log_s * y0                          # y0*log_pred0
    if x.shape[0] > 1:
        fg_logp = (jnp.sum(y[1:] * xm[1:], axis=0)
                   - log_s * jnp.sum(y[1:], axis=0))           # sum_{c>0} y_c*log_pred_c
    else:
        fg_logp = jnp.zeros_like(log_s)

    if gamma == 0.0:
        # (1 - pred0)**0 == 1: pred0 (and its clip) is never needed.
        contrib = (-scale) * ((1.0 - delta) * bg_logp + delta * fg_logp)
    else:
        # pred0 = exp(log_softmax0): one EUP exp instead of a VALU divide.
        pred0 = jnp.clip(jnp.exp(xm[0] - log_s), eps, 1.0 - eps)
        base = 1.0 - pred0
        if gamma == 1.0:
            w = base
        elif gamma == 2.0:
            w = base * base
        else:
            w = jnp.power(base, gamma)
        contrib = (-scale) * ((1.0 - delta) * w * bg_logp + delta * fg_logp)

    if needs_mask:
        # Last row-block may extend past the array (garbage rows), and a
        # padded (fully out-of-bounds, clamped) tile may exist for the
        # megacore split: gate the contribution per row.  Garbage can be
        # NaN/inf; jnp.where is a select so it never contaminates valid rows.
        g = pl.program_id(1) * tiles_per_par + t          # unclamped tile idx
        remaining = rows_valid - g * contrib.shape[0]
        row = lax.broadcasted_iota(jnp.int32, contrib.shape, 0)
        contrib = jnp.where(row < remaining, contrib, 0.0)

    acc_ref[...] += contrib

    @pl.when(t == pl.num_programs(2) - 1)
    def _():
        acc = acc_ref[...]
        if reduce_rows:
            # (R,128) -> (8,128): vreg-wise adds (free); shrinks the HBM
            # writeback and the follow-up JAX reduction by R/8x.
            acc = acc.reshape(acc.shape[0] // 8, 8, acc.shape[1]).sum(axis=0)
        out_ref[...] = acc[None, None]


def _vmem_limit_bytes():
    """Chip-aware scoped-VMEM limit (v7x only has 64 MiB physical VMEM)."""
    try:
        cap = pltpu.get_tpu_info().vmem_capacity_bytes
    except Exception:
        cap = 64 * 1024 * 1024                  # conservative (v7x-sized)
    return int(min(int(cap * 0.70), 48 * 1024 * 1024))


def _choose_tile_rows(C, s_rows, in_bytes, vmem_limit, max_rows_per_tile):
    """Rows-per-tile from a VMEM budget: 2 inputs x 2 pipeline buffers at the
    input dtype plus ~6 f32-sized (C,R,128) compiler temporaries."""
    per_row = C * LANE * (4 * in_bytes + 6 * 4)
    r = int(0.8 * vmem_limit) // per_row
    r = max(8, min(1024, (r // 8) * 8))
    if max_rows_per_tile is not None:
        r = max(8, min(r, (int(max_rows_per_tile) // 8) * 8))
    if s_rows <= r:
        return s_rows, 1                        # single full-extent row block
    return r, pl.cdiv(s_rows, r)


def modified_focal_loss(logs, yb_oh, gamma=0.0, delta=0.5, scale=2.0,
                        eps=1e-5, max_rows_per_tile=None):
    """logs, yb_oh: NCHW arrays (f32 / bf16, consumed at their HBM dtype).
    Returns a scalar f32 loss.  For best bandwidth, pass bf16 inputs from the
    producer; no wrapper-side casts are inserted here."""
    N, C, H, W = logs.shape
    assert yb_oh.shape == logs.shape
    S = H * W
    P = N * S                                   # true pixel count for the mean

    s_rows = pl.cdiv(S, LANE)
    S_pad = s_rows * LANE
    logs_f = logs.reshape(N, C, S)              # free view of contiguous NCHW
    y_f = yb_oh.reshape(N, C, S)
    if S_pad != S:
        # Pad only to the next multiple of 128 (minimum for the (rows, 128)
        # view).  Zero logits + zero one-hot contribute exactly 0.  All
        # further raggedness is masked in-kernel instead of padded in HBM.
        pad = ((0, 0), (0, 0), (0, S_pad - S))
        logs_f = jnp.pad(logs_f, pad)
        y_f = jnp.pad(y_f, pad)
    logs_t = logs_f.reshape(N, C, s_rows, LANE)
    y_t = y_f.reshape(N, C, s_rows, LANE)

    in_bytes = max(jnp.dtype(logs.dtype).itemsize,
                   jnp.dtype(yb_oh.dtype).itemsize)
    vmem_limit = _vmem_limit_bytes()
    R, n_row_blocks = _choose_tile_rows(C, s_rows, in_bytes, vmem_limit,
                                        max_rows_per_tile)

    # Megacore (v7x, 2 TCs): even N balances via the batch axis (no wasted
    # tile on 1-TC chips); odd N (incl. 1) splits the row-tile axis in two.
    PAR = 2 if (N % 2 == 1 and n_row_blocks >= 2) else 1
    tiles_per_par = pl.cdiv(n_row_blocks, PAR)
    needs_mask = (PAR * tiles_per_par * R != s_rows)
    reduce_rows = (R % 8 == 0 and R > 8)
    R_out = 8 if reduce_rows else R

    if PAR * tiles_per_par == n_row_blocks:
        def in_idx(n, p, t):
            return (n, 0, p * tiles_per_par + t, 0)
    else:
        def in_idx(n, p, t):                    # clamp padded tiles in-bounds
            return (n, 0, jnp.minimum(p * tiles_per_par + t,
                                      n_row_blocks - 1), 0)

    kernel = functools.partial(
        _focal_kernel, gamma=float(gamma), delta=float(delta),
        scale=float(scale), eps=float(eps), rows_valid=s_rows,
        tiles_per_par=tiles_per_par, needs_mask=needs_mask,
        reduce_rows=reduce_rows)

    partials = pl.pallas_call(
        kernel,
        out_shape=jax.ShapeDtypeStruct((N, PAR, R_out, LANE), jnp.float32),
        grid_spec=pltpu.PrefetchScalarGridSpec(
            num_scalar_prefetch=0,
            grid=(N, PAR, tiles_per_par),
            in_specs=[
                pl.BlockSpec((pl.Squeezed(), C, R, LANE), in_idx),
                pl.BlockSpec((pl.Squeezed(), C, R, LANE), in_idx),
            ],
            out_specs=pl.BlockSpec((1, 1, R_out, LANE),
                                   lambda n, p, t: (n, p, 0, 0)),
            scratch_shapes=[pltpu.VMEM((R, LANE), jnp.float32)],
        ),
        compiler_params=pltpu.CompilerParams(
            dimension_semantics=("parallel", "parallel", "arbitrary"),
            vmem_limit_bytes=vmem_limit,
        ),
    )(logs_t, y_t)

    # Tiny final reduction + mean by the true, unpadded pixel count.
    return jnp.sum(partials) / jnp.float32(P)


def _reference(logs, yb_oh, gamma=0.0, delta=0.5, scale=2.0, eps=1e-5):
    pred = jnp.clip(jax.nn.softmax(logs, axis=1), eps, 1 - eps)
    log_pred = jax.nn.log_softmax(logs, axis=1)
    weight_bg = jnp.power(1 - pred[:, :1], gamma) * (1 - delta)
    focal_bg = -scale * weight_bg * yb_oh[:, :1] * log_pred[:, :1]
    focal_fg = -scale * delta * yb_oh[:, 1:] * log_pred[:, 1:]
    focal = jnp.concatenate([focal_bg, focal_fg], axis=1)
    return focal.sum(axis=1).mean()


def _make_inputs(key, N, C, H, W, dtype=jnp.float32):
    k1, k2 = jax.random.split(key)
    logs = jax.random.normal(k1, (N, C, H, W), dtype=jnp.float32).astype(dtype)
    labels = jax.random.randint(k2, (N, H, W), 0, C)
    yb_oh = jnp.transpose(jax.nn.one_hot(labels, C, dtype=dtype), (0, 3, 1, 2))
    return logs, yb_oh


if __name__ == "__main__":
    key = jax.random.PRNGKey(0)
    k1, k2, k3, k4 = jax.random.split(key, 4)

    # Case 1: aligned spatial extent (H*W % 128 == 0), even batch, gamma=0.
    logs, yb_oh = _make_inputs(k1, 2, 4, 16, 16)
    loss = jax.block_until_ready(modified_focal_loss(logs, yb_oh))
    ref = jax.block_until_ready(_reference(logs, yb_oh))
    assert jnp.allclose(loss, ref, rtol=1e-5, atol=1e-6), (loss, ref)

    # Case 2: gamma != 0 path on the same inputs.
    loss_g2 = jax.block_until_ready(modified_focal_loss(logs, yb_oh, gamma=2.0))
    ref_g2 = jax.block_until_ready(_reference(logs, yb_oh, gamma=2.0))
    assert jnp.allclose(loss_g2, ref_g2, rtol=1e-5, atol=1e-6), (loss_g2, ref_g2)

    # Case 3: ragged spatial extent, odd batch, tiny tiles -> exercises the
    # in-kernel row mask, the clamped fully-out-of-bounds tile and the
    # PAR=2 megacore split at a small size.
    logs_r, yb_oh_r = _make_inputs(k2, 1, 4, 45, 53)
    loss_r = jax.block_until_ready(
        modified_focal_loss(logs_r, yb_oh_r, gamma=2.0, max_rows_per_tile=8))
    ref_r = jax.block_until_ready(_reference(logs_r, yb_oh_r, gamma=2.0))
    assert jnp.allclose(loss_r, ref_r, rtol=1e-5, atol=1e-6), (loss_r, ref_r)

    # Case 4: multi-tile accumulation with the (R,128)->(8,128) epilogue fold
    # and a partial last block, odd channel count.
    logs_m, yb_oh_m = _make_inputs(k3, 2, 5, 48, 48)
    loss_m = jax.block_until_ready(
        modified_focal_loss(logs_m, yb_oh_m, max_rows_per_tile=16))
    ref_m = jax.block_until_ready(_reference(logs_m, yb_oh_m))
    assert jnp.allclose(loss_m, ref_m, rtol=1e-5, atol=1e-6), (loss_m, ref_m)

    # Case 5: bf16 inputs stay bf16 in HBM; the kernel widens in-register.
    logs_bf, yb_oh_bf = _make_inputs(k4, 2, 4, 16, 16, dtype=jnp.bfloat16)
    loss_bf = jax.block_until_ready(modified_focal_loss(logs_bf, yb_oh_bf))
    ref_bf = jax.block_until_ready(
        _reference(logs_bf.astype(jnp.float32), yb_oh_bf.astype(jnp.float32)))
    assert jnp.allclose(loss_bf, ref_bf, rtol=1e-5, atol=1e-6), (loss_bf, ref_bf)

    print("KERNEL_OK")
</pallas_src>

<mosaic_0001>
module attributes {stable_mosaic.version = 11 : i64} {
  func.func @_focal_kernel(%arg0: i32, %arg1: i32, %arg2: i32, %arg3: memref<1x4x2x128xf32, #tpu.memory_space<vmem>>, %arg4: memref<1x4x2x128xf32, #tpu.memory_space<vmem>>, %arg5: memref<1x1x2x128xf32, #tpu.memory_space<vmem>>, %arg6: memref<2x128xf32, #tpu.memory_space<vmem>>) attributes {dimension_semantics = [#tpu.dimension_semantics<parallel>, #tpu.dimension_semantics<parallel>, #tpu.dimension_semantics<arbitrary>], iteration_bounds = array<i64: 2, 1, 1>, scalar_prefetch = 0 : i64, scratch_operands = 1 : i64, tpu.core_type = #tpu.core_type<tc>, window_params = [{transform_indices = @transform_0, window_bounds = array<i64: 1, 4, 2, 128>}, {transform_indices = @transform_1, window_bounds = array<i64: 1, 4, 2, 128>}, {transform_indices = @transform_2, window_bounds = array<i64: 1, 1, 2, 128>}]} {
    %c0_i32 = arith.constant 0 : i32
    %0 = arith.cmpi eq, %arg2, %c0_i32 : i32
    %1 = arith.extui %0 : i1 to i32
    %c0_i32_0 = arith.constant 0 : i32
    %2 = arith.cmpi ne, %1, %c0_i32_0 : i32
    scf.if %2 {
      %cst_20 = arith.constant 0.000000e+00 : f32
      %42 = vector.broadcast %cst_20 : f32 to vector<2x128xf32>
      %c0_21 = arith.constant 0 : index
      %c0_22 = arith.constant 0 : index
      %43 = vector.load %arg6[%c0_21, %c0_22] : memref<2x128xf32, #tpu.memory_space<vmem>>, vector<2x128xf32>
      tpu.vector_store %arg6[%c0_21, %c0_22], %42 {strides = array<i32>} : memref<2x128xf32, #tpu.memory_space<vmem>>, vector<2x128xf32>,
    } else {
    }
    %c0 = arith.constant 0 : index
    %c0_1 = arith.constant 0 : index
    %c0_2 = arith.constant 0 : index
    %c0_3 = arith.constant 0 : index
    %3 = vector.load %arg3[%c0, %c0_1, %c0_2, %c0_3] : memref<1x4x2x128xf32, #tpu.memory_space<vmem>>, vector<1x4x2x128xf32>
    %4 = vector.shape_cast %3 : vector<1x4x2x128xf32> to vector<4x2x128xf32>
    %c0_4 = arith.constant 0 : index
    %c0_5 = arith.constant 0 : index
    %c0_6 = arith.constant 0 : index
    %c0_7 = arith.constant 0 : index
    %5 = vector.load %arg4[%c0_4, %c0_5, %c0_6, %c0_7] : memref<1x4x2x128xf32, #tpu.memory_space<vmem>>, vector<1x4x2x128xf32>
    %6 = vector.shape_cast %5 : vector<1x4x2x128xf32> to vector<4x2x128xf32>
    %cst = arith.constant dense<0xFF800000> : vector<2x128xf32>
    %7 = vector.multi_reduction <maximumf>, %4, %cst [0] : vector<4x2x128xf32> to vector<2x128xf32>
    %8 = vector.shape_cast %7 : vector<2x128xf32> to vector<1x2x128xf32>
    %9 = vector.broadcast %8 : vector<1x2x128xf32> to vector<4x2x128xf32>
    %10 = arith.subf %4, %9 : vector<4x2x128xf32>
    %11 = math.exp %10 : vector<4x2x128xf32>
    %cst_8 = arith.constant dense<0.000000e+00> : vector<2x128xf32>
    %12 = vector.multi_reduction <add>, %11, %cst_8 [0] : vector<4x2x128xf32> to vector<2x128xf32>
    %13 = math.log %12 : vector<2x128xf32>
    %14 = vector.extract_strided_slice %6 {offsets = [0, 0, 0], sizes = [1, 2, 128], strides = [1, 1, 1]} : vector<4x2x128xf32> to vector<1x2x128xf32>
    %15 = vector.shape_cast %14 : vector<1x2x128xf32> to vector<2x128xf32>
    %16 = vector.extract_strided_slice %10 {offsets = [0, 0, 0], sizes = [1, 2, 128], strides = [1, 1, 1]} : vector<4x2x128xf32> to vector<1x2x128xf32>
    %17 = vector.shape_cast %16 : vector<1x2x128xf32> to vector<2x128xf32>
    %18 = arith.mulf %15, %17 : vector<2x128xf32>
    %19 = arith.mulf %13, %15 : vector<2x128xf32>
    %20 = arith.subf %18, %19 : vector<2x128xf32>
    %21 = vector.extract_strided_slice %6 {offsets = [1, 0, 0], sizes = [3, 2, 128], strides = [1, 1, 1]} : vector<4x2x128xf32> to vector<3x2x128xf32>
    %22 = vector.extract_strided_slice %10 {offsets = [1, 0, 0], sizes = [3, 2, 128], strides = [1, 1, 1]} : vector<4x2x128xf32> to vector<3x2x128xf32>
    %23 = arith.mulf %21, %22 : vector<3x2x128xf32>
    %cst_9 = arith.constant dense<0.000000e+00> : vector<2x128xf32>
    %24 = vector.multi_reduction <add>, %23, %cst_9 [0] : vector<3x2x128xf32> to vector<2x128xf32>
    %25 = vector.extract_strided_slice %6 {offsets = [1, 0, 0], sizes = [3, 2, 128], strides = [1, 1, 1]} : vector<4x2x128xf32> to vector<3x2x128xf32>
    %cst_10 = arith.constant dense<0.000000e+00> : vector<2x128xf32>
    %26 = vector.multi_reduction <add>, %25, %cst_10 [0] : vector<3x2x128xf32> to vector<2x128xf32>
    %27 = arith.mulf %13, %26 : vector<2x128xf32>
    %28 = arith.subf %24, %27 : vector<2x128xf32>
    %cst_11 = arith.constant 5.000000e-01 : f32
    %29 = vector.broadcast %cst_11 : f32 to vector<2x128xf32>
    %30 = arith.mulf %29, %20 : vector<2x128xf32>
    %cst_12 = arith.constant 5.000000e-01 : f32
    %31 = vector.broadcast %cst_12 : f32 to vector<2x128xf32>
    %32 = arith.mulf %31, %28 : vector<2x128xf32>
    %33 = arith.addf %30, %32 : vector<2x128xf32>
    %cst_13 = arith.constant -2.000000e+00 : f32
    %34 = vector.broadcast %cst_13 : f32 to vector<2x128xf32>
    %35 = arith.mulf %34, %33 : vector<2x128xf32>
    %c0_14 = arith.constant 0 : index
    %c0_15 = arith.constant 0 : index
    %36 = vector.load %arg6[%c0_14, %c0_15] : memref<2x128xf32, #tpu.memory_space<vmem>>, vector<2x128xf32>
    %37 = arith.addf %36, %35 : vector<2x128xf32>
    %c0_16 = arith.constant 0 : index
    %c0_17 = arith.constant 0 : index
    %38 = vector.load %arg6[%c0_16, %c0_17] : memref<2x128xf32, #tpu.memory_space<vmem>>, vector<2x128xf32>
    tpu.vector_store %arg6[%c0_16, %c0_17], %37 {strides = array<i32>} : memref<2x128xf32, #tpu.memory_space<vmem>>, vector<2x128xf32>,
    %c0_i32_18 = arith.constant 0 : i32
    %39 = arith.cmpi eq, %arg2, %c0_i32_18 : i32
    %40 = arith.extui %39 : i1 to i32
    %c0_i32_19 = arith.constant 0 : i32
    %41 = arith.cmpi ne, %40, %c0_i32_19 : i32
    scf.if %41 {
      %c0_20 = arith.constant 0 : index
      %c0_21 = arith.constant 0 : index
      %42 = vector.load %arg6[%c0_20, %c0_21] : memref<2x128xf32, #tpu.memory_space<vmem>>, vector<2x128xf32>
      %43 = vector.shape_cast %42 : vector<2x128xf32> to vector<1x1x2x128xf32>
      %c0_22 = arith.constant 0 : index
      %c0_23 = arith.constant 0 : index
      %c0_24 = arith.constant 0 : index
      %c0_25 = arith.constant 0 : index
      %44 = vector.load %arg5[%c0_22, %c0_23, %c0_24, %c0_25] : memref<1x1x2x128xf32, #tpu.memory_space<vmem>>, vector<1x1x2x128xf32>
      tpu.vector_store %arg5[%c0_22, %c0_23, %c0_24, %c0_25], %43 {strides = array<i32>} : memref<1x1x2x128xf32, #tpu.memory_space<vmem>>, vector<1x1x2x128xf32>,
    } else {
    }
    return
  }
  func.func @transform_0(%arg0: i32, %arg1: i32, %arg2: i32) -> (i32, i32, i32, i32) {
    %c1_i32 = arith.constant 1 : i32
    %0 = arith.muli %arg1, %c1_i32 : i32
    %1 = arith.addi %0, %arg2 : i32
    %c0_i32 = arith.constant 0 : i32
    %c0_i32_0 = arith.constant 0 : i32
    %c0_i32_1 = arith.constant 0 : i32
    return %arg0, %c0_i32, %1, %c0_i32_0 : i32, i32, i32, i32
  }
  func.func @transform_1(%arg0: i32, %arg1: i32, %arg2: i32) -> (i32, i32, i32, i32) {
    %c1_i32 = arith.constant 1 : i32
    %0 = arith.muli %arg1, %c1_i32 : i32
    %1 = arith.addi %0, %arg2 : i32
    %c0_i32 = arith.constant 0 : i32
    %c0_i32_0 = arith.constant 0 : i32
    %c0_i32_1 = arith.constant 0 : i32
    return %arg0, %c0_i32, %1, %c0_i32_0 : i32, i32, i32, i32
  }
  func.func @transform_2(%arg0: i32, %arg1: i32, %arg2: i32) -> (i32, i32, i32, i32) {
    %c0_i32 = arith.constant 0 : i32
    %c0_i32_0 = arith.constant 0 : i32
    %c0_i32_1 = arith.constant 0 : i32
    return %arg0, %arg1, %c0_i32, %c0_i32_0 : i32, i32, i32, i32
  }
}

</mosaic_0001>

<bundles_post_ra>
// kernel: tpu_custom_call.1
= control target key start
LH: loop header
LB: loop body
LE: loop exit
PB: predicated region body
PF: predicated region fallthrough
CT: control target
= control target key end

     0   :  { %7 = vsyncpa [#allocation4], 0  ;;  %s892_s0 = inlined_call_operand.hbm [shape: f32[2,4,2,128], index: 0, kind: input, shape index: {}]   ;;  %s893_s1 = inlined_call_operand.hbm [shape: f32[2,4,2,128], index: 1, kind: input, shape index: {}]   ;;  %s894_s2 = inlined_call_operand.hbm [shape: f32[2,1,2,128], index: 2, kind: output, shape index: {}]  }
   0x1   :  { %9 = vsyncpa [#allocation4 + $0x1], 0 }
   0x2   :  { %10 = vsyncpa [#allocation7], 0 }
   0x3   :  { %12 = vsyncpa [#allocation7 + $0x1], 0 }
   0x4   :  { %13 = vsyncpa [#allocation5], 0 }
   0x5   :  { %15 = vsyncpa [#allocation5 + $0x1], 0  ;;  %s698_s9 = smov 0   ;;  %s700_s10 = smov 0  }
   0x6   :  { %s702_s11 = smov 0   ;;  %s704_s12 = smov 0  }
   0x7   :  { %s706_s13 = smov 0   ;;  %s708_s14 = smov 0  }
   0x8 LB: > { %s435_s15 = sadd.s32 4294967295, %s675_s14   ;;  %s436_s16 = sadd.s32 4294967294, %s675_s14   ;;  %s675_s14 = sphi %s708_s14, %s21_s14   ;;  %s671_s13 = sphi %s706_s13, %s906_s13   ;;  %s667_s12 = sphi %s704_s12, %s905_s12   ;;  %s663_s11 = sphi %s702_s11, %s904_s11   ;;  %s659_s10 = sphi %s700_s10, %s903_s10   ;;  %s655_s9 = sphi %s698_s9, %s902_s9  }
   0x9   : > { %s40_s17 = sadd.s32 1, %s671_s13  ;;  %s51_s18 = sadd.s32 1, %s663_s11 }
   0xa   : > { %p42_p0 = scmp.ge.s32.totalorder %s40_s17, 2  ;;  %p58_p1 = scmp.ne.s32.totalorder %s663_s11, %s659_s10 }
   0xb   : > { %p59_p2 = scmp.eq.s32.totalorder %s675_s14, 0  ;;  %p64_p3 = scmp.ne.s32.totalorder %s659_s10, %s655_s9 }
   0xc   : > { %s908_s17 = smov (%p42_p0, %s40_s17), 0  ;;  %p65_p5 = scmp.eq.s32.totalorder %s435_s15, 0 }
   0xd   : > { %p739_p4 = por %p59_p2, %p58_p1  ;;  %s46_s20 = ssub.s32 %s671_s13, %s908_s17 }
   0xe   : > { %p120_p6 = scmp.eq.s32.totalorder %s435_s15, 1  ;;  %p49_p7 = scmp.eq.s32.totalorder %s46_s20, 0 }
   0xf   : > { %p745_p8 = por %p65_p5, %p64_p3  ;;  %p126_p10 = scmp.eq.s32.totalorder %s436_s16, 1 }
  0x10   : > { %p749_p9 = por %p120_p6, %p58_p1  ;;  %p472_p13 = scmp.lt.s32.totalorder %s675_s14, 2 }
  0x11   : > { %s754_s23 = scalar_select %p49_p7, %s663_s11, %s51_s18  }
  0x12   : > { %p756_p11 = por %p126_p10, %p64_p3  ;;  %s763_s25 = sand.u32 1, %s663_s11  }
  0x13   : > { %s439_s26 = sshll.u32 %s763_s25, 3  ;;  %s453_s27 = sshll.u32 %s671_s13, 7 }
  0x14   : > { %s158_s30 = scalar_lea.hbm %s892_s0, %s453_s27  ;;  %s150_s3 = scalar_lea.vmem [#allocation3], %s439_s26 }
  0x15   : > { %s159_s4 = sshll.u32 %s150_s3, 4  ;;  %p776_p0 = pnand %p472_p13, %p739_p4  ;;  %s160_s4 = int_to_ptr.vmem [resolvable:$true] %s159_s4 }
  0x16   : > { %p445_p1 = scmp.ge.s32.totalorder %s675_s14, 1  ;;  %s147_s6 = scalar_lea.sflag [#allocation4], %s763_s25 }
  0x17   : > { %p537_p2 = pneg %p776_p0  ;;  %s548_s7 = scalar_lea.vmem %s160_s4, 128 }
  0x18   : > { %p549_p3 = scmp.ne.s32.totalorder %s160_s4, %s548_s7  ;;  %s677_s8 = smov [#allocation3]  }
  0x19   : > { %s553_s15 = sshll.u32 %s677_s8, 4  ;;  %s554_s15 = int_to_ptr.vmem [resolvable:$false] %s553_s15 }
  0x1a   : > { %p551_p5 = pnand %p549_p3, %p537_p2  ;;  %s555_s16 = scalar_lea.vmem %s554_s15, 256 }
  0x1b   : > { %p556_p4 = scmp.lt.s32.totalorder %s160_s4, %s554_s15  ;;  %p557_p7 = scmp.lt.s32.totalorder %s555_s16, %s548_s7 }
  0x1c   : > { %p552_p6 = pneg %p551_p5 }
  0x1d   : > { %p558_p10 = por %p557_p7, %p556_p4 }
  0x1f   : > { %p559_p13 = pnand %p558_p10, %p552_p6 }
  0x21   : > { %562 = shalt.err (!%p559_p13)
}
  0x22   : > { %s678_s18 = smov 32   ;;  %s679_s19 = smov 2  }
  0x23   : > { %464 = dma.hbm_to_vmem [thread:$0]  (!%p776_p0), %s158_s30, 128, %s160_s4, %s147_s6, %s678_s18, %s678_s18, %s679_s19  }
  0x24   : > { %p190_p3 = scmp.lt.s32.totalorder %s675_s14, 3  ;;  %s181_s29 = scalar_lea.hbm %s893_s1, %s453_s27 }
  0x25   : > { %s173_s7 = scalar_lea.vmem [#allocation6], %s439_s26  ;;  %s170_s15 = scalar_lea.sflag [#allocation7], %s763_s25 }
  0x26   : > { %p797_p5 = pnand %p445_p1, %p190_p3  ;;  %s182_s8 = sshll.u32 %s173_s7, 4  ;;  %s183_s8 = int_to_ptr.vmem [resolvable:$true] %s182_s8 }
  0x27   : > { %s576_s16 = scalar_lea.vmem %s183_s8, 128  ;;  %s680_s30 = smov [#allocation6]  }
  0x28   : > { %p577_p6 = scmp.ne.s32.totalorder %s183_s8, %s576_s16  ;;  %s581_s4 = sshll.u32 %s680_s30, 4  ;;  %s582_s4 = int_to_ptr.vmem [resolvable:$false] %s581_s4 }
  0x29   : > { %s583_s27 = scalar_lea.vmem %s582_s4, 256  ;;  %p584_p10 = scmp.lt.s32.totalorder %s183_s8, %s582_s4 }
  0x2a   : > { %p579_p4 = pnand %p577_p6, %p537_p2  ;;  %p585_p1 = scmp.lt.s32.totalorder %s583_s27, %s576_s16 }
  0x2c   : > { %p580_p7 = pneg %p579_p4  ;;  %p586_p13 = por %p585_p1, %p584_p10 }
  0x2e   : > { %p587_p3 = pnand %p586_p13, %p580_p7 }
  0x30   : > { %590 = shalt.err (!%p587_p3)
}
  0x31   : > { %467 = dma.hbm_to_vmem [thread:$0]  (!%p776_p0), %s181_s29, 128, %s183_s8, %s170_s15, %s678_s18, %s678_s18, %s679_s19  }
  0x32   : > { %194 = sbr.rel (%p797_p5) target bundleno = 141 (0x8d), region = 28  ;;  %s812_s25 = sand.u32 (!%p797_p5), 1, %s659_s10  }
  0x33   : > { %s446_s26 = sshll.u32 (!%p797_p5), %s812_s25, 3  ;;  %s197_s6 = scalar_lea.sflag (!%p797_p5), [#allocation4], %s812_s25 }
  0x34   : > { %s200_s20 = scalar_lea.vmem (!%p797_p5), [#allocation3], %s446_s26 }
  0x37   : > { %642 = dma.done.wait (%p745_p8), %s197_s6, 128  }
  0x38   : > { %644 = vsyncadd (%p745_p8), %s197_s6, 4294967168  ;;  %s206_s5 = scalar_lea.sflag [#allocation7], %s812_s25  ;;  %s821_s18 = scalar_lea.vmem [#allocation6], %s446_s26 }
  0x39   : > { %646 = dma.done.wait (%p745_p8), %s206_s5, 128  }
  0x3a   : > { %648 = vsyncadd (%p745_p8), %s206_s5, 4294967168  ;;  %v681_v0 = vmov 0.0   ;;  %vm250_vm0 = vcmask 1041408   ;;  %v242_v1 = vld [vmem:[%s200_s20] sm:$0x3]  ;;  %s448_s21 = sshll.u32 %s812_s25, 1 }
  0x3b   : > { %241 = vst [vmem:[#allocation2] sm:$0x3] %v681_v0  ;;  %v243_v2 = vld [vmem:[%s200_s20 + $0x2] sm:$0x3]  ;;  %v244_v3 = vld [vmem:[%s200_s20 + $0x4] sm:$0x3] }
  0x3c   : > { %v245_v4 = vld [vmem:[%s200_s20 + $0x6] sm:$0x3]  ;;  %v251_v5 = vsel %vm250_vm0, %v242_v1, -inf  ;;  %v252_v6 = vsel %vm250_vm0, %v243_v2, -inf  ;;  %v253_v7 = vsel %vm250_vm0, %v244_v3, -inf  ;;  %s234_s19 = scalar_lea.vmem [#allocation8], %s448_s21 }
  0x3d   : > { %v254_v8 = vsel %vm250_vm0, %v245_v4, -inf  ;;  %v255_v9 = vmax.f32 %v251_v5, %v252_v6  ;;  %v247_v31 = vld [vmem:[%s821_s18 + $0x2] sm:$0x3]  ;;  %v248_v32 = vld [vmem:[%s821_s18 + $0x4] sm:$0x3]  ;;  %s324_s28 = sshll.u32 %s234_s19, 4  ;;  %s847_s28 = int_to_ptr.vmem [resolvable:$true] %s324_s28 }
  0x3e   : > { %v256_v10 = vmax.f32 %v253_v7, %v254_v8  ;;  %v249_v35 = vld [vmem:[%s821_s18 + $0x6] sm:$0x3]  ;;  %v290_v36 = vsel %vm250_vm0, %v247_v31, 0.0  ;;  %v291_v37 = vsel %vm250_vm0, %v248_v32, 0.0  ;;  %v246_v44 = vld [vmem:[%s821_s18] sm:$0x3] }
  0x3f   : > { %v292_v41 = vadd.f32 %v291_v37, %v290_v36  ;;  %v293_v42 = vsel %vm250_vm0, %v249_v35, 0.0  ;;  %s450_s29 = sshll.u32 %s667_s12, 5  ;;  %s310_s15 = scalar_lea.sflag [#allocation5], %s812_s25 }
  0x40   : > { %v257_v11 = vmax.f32 %v255_v9, %v256_v10  ;;  %s322_s8 = scalar_lea.hbm %s894_s2, %s450_s29  ;;  %s591_s16 = scalar_lea.vmem %s847_s28, 32 }
  0x41   : > { %v294_v46 = vadd.f32 %v293_v42, %v292_v41  ;;  %p592_p8 = scmp.ne.s32.totalorder %s847_s28, %s591_s16  ;;  %s682_s30 = smov [#allocation8]  }
  0x42   : > { %v258_v12 = vsub.f32 %v242_v1, %v257_v11  ;;  %v259_v13 = vsub.f32 %v243_v2, %v257_v11  ;;  %v260_v14 = vsub.f32 %v244_v3, %v257_v11  ;;  %v261_v15 = vsub.f32 %v245_v4, %v257_v11  ;;  %v301_v58 = vld [vmem:[#allocation2] sm:$0x3]  ;;  %s595_s4 = sshll.u32 %s682_s30, 4  ;;  %s596_s4 = int_to_ptr.vmem [resolvable:$false] %s595_s4 }
  0x43   : > { %p593_p0 = pnand %p592_p8, %p749_p9  ;;  %s597_s12 = scalar_lea.vmem %s596_s4, 64 }
  0x44   : > { %v262_v16 = vmul.f32 1.442695, %v258_v12  ;;  %v264_v17 = vmul.f32 1.442695, %v259_v13  ;;  %v266_v18 = vmul.f32 1.442695, %v260_v14  ;;  %v282_v33 = vmul.f32 %v259_v13, %v247_v31  ;;  %p598_p5 = scmp.lt.s32.totalorder %s847_s28, %s596_s4  ;;  %p599_p6 = scmp.lt.s32.totalorder %s597_s12, %s591_s16 }
  0x45   : > { %v268_v19 = vmul.f32 1.442695, %v261_v15  ;;  %v283_v34 = vmul.f32 %v260_v14, %v248_v32  ;;  %v284_v38 = vmul.f32 %v261_v15, %v249_v35  ;;  %v279_v49 = vmul.f32 %v258_v12, %v246_v44  ;;  %p594_p2 = pneg %p593_p0 }
  0x46   : > { %525 = vpow2.f32 %v262_v16  ;;  %v285_v39 = vsel %vm250_vm0, %v282_v33, 0.0  ;;  %p600_p4 = por %p599_p6, %p598_p5 }
  0x47   : > { %527 = vpow2.f32 %v264_v17  ;;  %v286_v40 = vsel %vm250_vm0, %v283_v34, 0.0  ;;  %v288_v45 = vsel %vm250_vm0, %v284_v38, 0.0 }
  0x48   : > { %529 = vpow2.f32 %v266_v18  ;;  %v287_v43 = vadd.f32 %v286_v40, %v285_v39  ;;  %p601_p7 = pnand %p600_p4, %p594_p2 }
  0x49   : > { %531 = vpow2.f32 %v268_v19 }
  0x4a   : > { %v289_v50 = vadd.f32 %v288_v45, %v287_v43 }
  0x53   : > { %v526_v20 = vpop.eup %525 }
  0x54   : > { %v528_v21 = vpop.eup %527  ;;  %v270_v22 = vsel %vm250_vm0, %v526_v20, 0.0 }
  0x55   : > { %v530_v23 = vpop.eup %529  ;;  %v271_v24 = vsel %vm250_vm0, %v528_v21, 0.0 }
  0x56   : > { %v532_v25 = vpop.eup %531  ;;  %v272_v26 = vadd.f32 %v271_v24, %v270_v22  ;;  %v273_v27 = vsel %vm250_vm0, %v530_v23, 0.0 }
  0x57   : > { %v275_v28 = vsel %vm250_vm0, %v532_v25, 0.0 }
  0x58   : > { %v274_v29 = vadd.f32 %v273_v27, %v272_v26 }
  0x5a   : > { %v276_v30 = vadd.f32 %v275_v28, %v274_v29 }
  0x5c   : > { %533 = vlog2.f32 %v276_v30 }
  0x69   : > { %v534_v47 = vpop.eup %533 }
  0x6a   : > { %v278_v48 = vmul.f32 0.6931472, %v534_v47 }
  0x6c   : > { %v280_v51 = vmul.f32 %v278_v48, %v246_v44  ;;  %v295_v52 = vmul.f32 %v294_v46, %v278_v48 }
  0x6e   : > { %v281_v53 = vsub.f32 %v279_v49, %v280_v51  ;;  %v296_v54 = vsub.f32 %v289_v50, %v295_v52 }
  0x70   : > { %v297_v55 = vmul.f32 0.5, %v281_v53  ;;  %v298_v56 = vmul.f32 0.5, %v296_v54 }
  0x72   : > { %v299_v57 = vadd.f32 %v298_v56, %v297_v55 }
  0x74   : > { %v300_v59 = vmul.f32 -2.0, %v299_v57 }
  0x76   : > { %v302_v60 = vadd.f32 %v301_v58, %v300_v59 }
  0x78   : > { %303 = vst [vmem:[#allocation2] sm:$0x3] %v302_v60 }
  0x7f   : > { %v307_v61 = vld [vmem:[#allocation2] sm:$0x3] }
  0x80   : > { %308 = vst [vmem:[%s234_s19] sm:$0x3] %v307_v61 }
  0x81   : > { %604 = shalt.err (!%p601_p7)
}
  0x82   : > { %s605_s27 = scalar_lea.hbm %s322_s8, 32  ;;  %s609_s6 = scalar_lea.hbm %s894_s2, 64 }
  0x83   : > { %p606_p10 = scmp.ne.s32.totalorder %s322_s8, %s605_s27  ;;  %p610_p3 = scmp.lt.s32.totalorder %s322_s8, %s894_s2 }
  0x84   : > { %p611_p8 = scmp.lt.s32.totalorder %s609_s6, %s605_s27 }
  0x85   : > { %p607_p1 = pnand %p606_p10, %p749_p9 }
  0x86   : > { %p612_p0 = por %p611_p8, %p610_p3 }
  0x87   : > { %p608_p13 = pneg %p607_p1 }
  0x89   : > { %p613_p12 = pnand %p612_p0, %p608_p13 }
  0x8b   : > { %616 = shalt.err (!%p613_p12)
}
  0x8c   : > { %459 = dma.vmem_to_hbm [thread:$0]  (%p749_p9), %s847_s28, 32, %s322_s8, %s310_s15  }
  0x8d PF: > { %s336_s18 = sand.u32 1, %s655_s9   ;;  %p901_p2 = scmp.ge.s32.totalorder %s675_s14, 2 }
  0x8e   : > { %s337_s21 = scalar_lea.sflag [#allocation5], %s336_s18 }
  0x8f   : > { %p469_p5 = pnand %p901_p2, %p756_p11 }
  0x91   : > { %p470_p6 = pneg %p469_p5 }
  0x93   : > { %650 = dma.done.wait (%p470_p6), %s337_s21, 32  }
  0x94   : > { %652 = vsyncadd (%p470_p6), %s337_s21, 4294967264  ;;  %s21_s14 = sadd.s32 1, %s675_s14   ;;  %s902_s9 = smov %s659_s10 }
  0x95   : > { %p18_p4 = scmp.ge.s32.totalorder %s21_s14, 4   ;;  %s903_s10 = smov %s663_s11 }
  0x96   : > { %s904_s11 = smov %s754_s23  ;;  %s905_s12 = smov %s671_s13 }
  0x97   : > { %s906_s13 = smov %s908_s17  ;;  %20 = sbr.rel (!%p18_p4) target bundleno = 8 (0x8), region = 94 }
  0x9c   :  { %342 = vsyncpa [#allocation4], 1 }
  0x9d   :  { %344 = vsyncpa [#allocation4 + $0x1], 1 }
  0x9e   :  { %345 = vsyncpa [#allocation7], 1 }
  0x9f   :  { %347 = vsyncpa [#allocation7 + $0x1], 1 }
  0xa0   :  { %348 = vsyncpa [#allocation5], 1 }
  0xa1   :  { %350 = vsyncpa [#allocation5 + $0x1], 1 }

</bundles_post_ra>
